<compile_context>
chip_gen: v5e
topology: v5e:2x2
jax: 0.10.0
libtpu: 0.0.40
codegen_flags: <defaults>
</compile_context>

<pallas_src>
import functools

import numpy as np
import jax
import jax.numpy as jnp
from jax.experimental import pallas as pl
from jax.experimental.pallas import tpu as pltpu

EPS = 1e-5


def _boundary_masks(H, W):
    """Trace-time (9, H*W) f32 masks: 1 where the (dy, dx) neighbour is in-bounds."""
    f = np.arange(H * W)
    yy, xx = f // W, f % W
    m = np.empty((9, H * W), np.float32)
    for k in range(9):
        dy, dx = k // 3 - 1, k % 3 - 1
        m[k] = ((yy + dy >= 0) & (yy + dy < H) &
                (xx + dx >= 0) & (xx + dx < W)).astype(np.float32)
    return m


def _gen_block_kernel(x_ref, w_ref, m_ref, o_ref, col_ref, *, H, W):
    # x_ref:   (Bt, Cin, HW)    Bt instances, NCHW with spatial dims flattened
    # w_ref:   (Cout, 9*Cin)    conv weights, column index = (ky*3+kx)*Cin + ci
    # m_ref:   (9, HW)          precomputed boundary masks (static constants)
    # o_ref:   (Bt, Cout, HW)   output (HW multiple of 128 -> unmasked dense vst)
    # col_ref: (9*Cin, Bt*HW)   VMEM scratch holding the im2col slab
    Bt, Cin, HW = x_ref.shape

    # im2col: 9 rolled + boundary-masked taps per instance, written directly
    # into the scratch.  pltpu.roll issues on the XLU (separate bundle slot);
    # all wrap-around lanes coincide with masked-to-zero positions, so this is
    # exactly equivalent to the zero-padded convolution.
    for b in range(Bt):
        x_b = x_ref[b]                                        # (Cin, HW)
        for k in range(9):
            dy, dx = k // 3 - 1, k % 3 - 1
            off = dy * W + dx
            if off == 0:
                tap = x_b                                     # centre tap: no roll / mask
            else:
                rolled = pltpu.roll(x_b, shift=(-off) % HW, axis=1)
                tap = rolled * m_ref[k:k + 1, :]              # zero out-of-bounds taps
            col_ref[k * Cin:(k + 1) * Cin, b * HW:(b + 1) * HW] = (
                tap.astype(col_ref.dtype))

    # Conv2d (bias absorbed by the instance norm) as one MXU contraction.
    conv = jnp.dot(w_ref[...], col_ref[...],
                   preferred_element_type=jnp.float32)        # (Cout, Bt*HW)

    # InstanceNorm2d(affine=False) + ReLU, per instance (128-aligned lane slices).
    inv_n = 1.0 / HW
    for b in range(Bt):
        seg = conv[:, b * HW:(b + 1) * HW]                    # (Cout, HW)
        mean = jnp.sum(seg, axis=1, keepdims=True) * inv_n
        ex2 = jnp.sum(seg * seg, axis=1, keepdims=True) * inv_n
        var = ex2 - mean * mean
        normed = (seg - mean) * jax.lax.rsqrt(var + EPS)
        o_ref[b] = jnp.maximum(normed, 0.0).astype(o_ref.dtype)


def generator_basic_block(x_nchw, weight, bias=None, *, block_b=None,
                          use_bf16_matmul=False):
    """x_nchw: (B, Cin, H, W); weight: (Cout, Cin, 3, 3); bias: (Cout,) (absorbed)."""
    B, Cin, H, W = x_nchw.shape
    Cout = weight.shape[0]
    HW = H * W

    # Lane-dense stores require HW % 128 == 0 (true for generator resolutions).
    # TODO(synk): pad HW up to the next multiple of 128 (and mask the tail) for
    # resolutions where this does not hold, instead of storing a ragged lane dim.
    assert HW % 128 == 0, "pad H*W to a multiple of 128 for lane-dense stores"

    if block_b is None:
        # Keep >= 2 grid points when possible so v7x's two TensorCores both get
        # work; pass block_b=B on single-TC v5e/v6e to fully amortize the
        # ~0.35us per-grid-step overhead instead.
        block_b = max(1, B // 2)
        while B % block_b:
            block_b -= 1
    assert B % block_b == 0, "block_b must divide the batch size"
    Bt = block_b

    # NCHW-native: flattening spatial dims is a free reshape (no HBM transpose,
    # output is produced directly in the caller's layout).
    x_flat = x_nchw.reshape(B, Cin, HW)

    # (Cout, Cin, ky, kx) -> (Cout, ky, kx, Cin) -> (Cout, 9*Cin); tiny, one-time.
    w2 = jnp.transpose(weight, (0, 2, 3, 1)).reshape(Cout, 9 * Cin)
    acc_dtype = jnp.bfloat16 if use_bf16_matmul else jnp.float32
    w2 = w2.astype(acc_dtype)

    # Conv bias is exactly cancelled by InstanceNorm2d's mean subtraction.
    del bias

    masks = jnp.asarray(_boundary_masks(H, W))                # (9, HW) constants

    kernel = functools.partial(_gen_block_kernel, H=H, W=W)

    out_flat = pl.pallas_call(
        kernel,
        out_shape=jax.ShapeDtypeStruct((B, Cout, HW), x_nchw.dtype),
        grid=(B // Bt,),
        in_specs=[
            pl.BlockSpec((Bt, Cin, HW), lambda i: (i, 0, 0)),
            pl.BlockSpec((Cout, 9 * Cin), lambda i: (0, 0)),
            pl.BlockSpec((9, HW), lambda i: (0, 0)),
        ],
        out_specs=pl.BlockSpec((Bt, Cout, HW), lambda i: (i, 0, 0)),
        scratch_shapes=[pltpu.VMEM((9 * Cin, Bt * HW), acc_dtype)],
        compiler_params=pltpu.CompilerParams(
            dimension_semantics=("parallel",),
            # Explicit scoped-VMEM budget: v5e defaults to 16 MiB, v7x has only
            # 64 MiB physical; 32 MiB is safe on all three generations and
            # leaves room when scaling Cin/Cout/HW.
            vmem_limit_bytes=32 * 1024 * 1024),
    )(x_flat, w2, masks)

    return out_flat.reshape(B, Cout, H, W)


def _reference(x_nchw, weight, bias):
    """Pure-JAX reference (conv + bias -> instance norm -> relu) for validation."""
    y = jax.lax.conv_general_dilated(
        x_nchw, weight, window_strides=(1, 1), padding=((1, 1), (1, 1)),
        dimension_numbers=("NCHW", "OIHW", "NCHW"))
    y = y + bias[None, :, None, None]
    mean = jnp.mean(y, axis=(2, 3), keepdims=True)
    var = jnp.mean((y - mean) ** 2, axis=(2, 3), keepdims=True)
    y = (y - mean) * jax.lax.rsqrt(var + EPS)
    return jnp.maximum(y, 0.0)


if __name__ == "__main__":
    B, Cin, Cout, H, W = 2, 4, 8, 16, 16

    key = jax.random.PRNGKey(0)
    kx, kw, kb = jax.random.split(key, 3)
    x = jax.random.normal(kx, (B, Cin, H, W), dtype=jnp.float32)
    # Deterministic Conv2d-like init (uniform in +/- 1/sqrt(fan_in)).
    fan_in = Cin * 3 * 3
    bound = 1.0 / (fan_in ** 0.5)
    weight = jax.random.uniform(kw, (Cout, Cin, 3, 3), jnp.float32, -bound, bound)
    bias = jax.random.uniform(kb, (Cout,), jnp.float32, -bound, bound)

    ref = _reference(x, weight, bias)

    # Default tiling: one instance per grid step -> 2 parallel grid points
    # (keeps both v7x TensorCores busy).
    out1 = jax.block_until_ready(generator_basic_block(x, weight, bias))
    # Batched tiling: whole batch in one grid step (preferred on 1-TC v5e/v6e).
    out2 = jax.block_until_ready(generator_basic_block(x, weight, bias, block_b=B))

    assert out1.shape == (B, Cout, H, W)
    assert jnp.allclose(out1, ref, atol=1e-4, rtol=1e-4), "mismatch (grid=B) vs reference"
    assert jnp.allclose(out2, ref, atol=1e-4, rtol=1e-4), "mismatch (batched) vs reference"

    print("KERNEL_OK")
</pallas_src>

<mosaic_0001>
module attributes {stable_mosaic.version = 11 : i64} {
  func.func @_gen_block_kernel(%arg0: i32, %arg1: memref<1x4x256xf32, #tpu.memory_space<vmem>>, %arg2: memref<8x36xf32, #tpu.memory_space<vmem>>, %arg3: memref<9x256xf32, #tpu.memory_space<vmem>>, %arg4: memref<1x8x256xf32, #tpu.memory_space<vmem>>, %arg5: memref<36x256xf32, #tpu.memory_space<vmem>>) attributes {dimension_semantics = [#tpu.dimension_semantics<parallel>], iteration_bounds = array<i64: 2>, scalar_prefetch = 0 : i64, scratch_operands = 1 : i64, tpu.core_type = #tpu.core_type<tc>, window_params = [{transform_indices = @transform_0, window_bounds = array<i64: 1, 4, 256>}, {pipeline_mode = #tpu.pipeline_mode<synchronous>, transform_indices = @transform_1, window_bounds = array<i64: 8, 36>}, {pipeline_mode = #tpu.pipeline_mode<synchronous>, transform_indices = @transform_2, window_bounds = array<i64: 9, 256>}, {transform_indices = @transform_3, window_bounds = array<i64: 1, 8, 256>}]} {
    %c0 = arith.constant 0 : index
    %c0_0 = arith.constant 0 : index
    %c0_1 = arith.constant 0 : index
    %0 = vector.load %arg1[%c0, %c0_0, %c0_1] : memref<1x4x256xf32, #tpu.memory_space<vmem>>, vector<1x4x256xf32>
    %1 = vector.shape_cast %0 : vector<1x4x256xf32> to vector<4x256xf32>
    %c17_i32 = arith.constant 17 : i32
    %2 = tpu.dynamic_rotate %1 by %c17_i32 dim 1 : vector<4x256xf32>, i32 -> vector<4x256xf32>
    %c0_2 = arith.constant 0 : index
    %c0_3 = arith.constant 0 : index
    %3 = vector.load %arg3[%c0_2, %c0_3] : memref<9x256xf32, #tpu.memory_space<vmem>>, vector<1x256xf32>
    %4 = vector.broadcast %3 : vector<1x256xf32> to vector<4x256xf32>
    %5 = arith.mulf %2, %4 : vector<4x256xf32>
    %c0_4 = arith.constant 0 : index
    %c0_5 = arith.constant 0 : index
    %6 = vector.load %arg5[%c0_4, %c0_5] : memref<36x256xf32, #tpu.memory_space<vmem>>, vector<4x256xf32>
    tpu.vector_store %arg5[%c0_4, %c0_5], %5 {strides = array<i32>} : memref<36x256xf32, #tpu.memory_space<vmem>>, vector<4x256xf32>,
    %c16_i32 = arith.constant 16 : i32
    %7 = tpu.dynamic_rotate %1 by %c16_i32 dim 1 : vector<4x256xf32>, i32 -> vector<4x256xf32>
    %c1 = arith.constant 1 : index
    %c0_6 = arith.constant 0 : index
    %8 = vector.load %arg3[%c1, %c0_6] : memref<9x256xf32, #tpu.memory_space<vmem>>, vector<1x256xf32>
    %9 = vector.broadcast %8 : vector<1x256xf32> to vector<4x256xf32>
    %10 = arith.mulf %7, %9 : vector<4x256xf32>
    %c4 = arith.constant 4 : index
    %c0_7 = arith.constant 0 : index
    %11 = vector.load %arg5[%c4, %c0_7] : memref<36x256xf32, #tpu.memory_space<vmem>>, vector<4x256xf32>
    tpu.vector_store %arg5[%c4, %c0_7], %10 {strides = array<i32>} : memref<36x256xf32, #tpu.memory_space<vmem>>, vector<4x256xf32>,
    %c15_i32 = arith.constant 15 : i32
    %12 = tpu.dynamic_rotate %1 by %c15_i32 dim 1 : vector<4x256xf32>, i32 -> vector<4x256xf32>
    %c2 = arith.constant 2 : index
    %c0_8 = arith.constant 0 : index
    %13 = vector.load %arg3[%c2, %c0_8] : memref<9x256xf32, #tpu.memory_space<vmem>>, vector<1x256xf32>
    %14 = vector.broadcast %13 : vector<1x256xf32> to vector<4x256xf32>
    %15 = arith.mulf %12, %14 : vector<4x256xf32>
    %c8 = arith.constant 8 : index
    %c0_9 = arith.constant 0 : index
    %16 = vector.load %arg5[%c8, %c0_9] : memref<36x256xf32, #tpu.memory_space<vmem>>, vector<4x256xf32>
    tpu.vector_store %arg5[%c8, %c0_9], %15 {strides = array<i32>} : memref<36x256xf32, #tpu.memory_space<vmem>>, vector<4x256xf32>,
    %c1_i32 = arith.constant 1 : i32
    %17 = tpu.dynamic_rotate %1 by %c1_i32 dim 1 : vector<4x256xf32>, i32 -> vector<4x256xf32>
    %c3 = arith.constant 3 : index
    %c0_10 = arith.constant 0 : index
    %18 = vector.load %arg3[%c3, %c0_10] : memref<9x256xf32, #tpu.memory_space<vmem>>, vector<1x256xf32>
    %19 = vector.broadcast %18 : vector<1x256xf32> to vector<4x256xf32>
    %20 = arith.mulf %17, %19 : vector<4x256xf32>
    %c12 = arith.constant 12 : index
    %c0_11 = arith.constant 0 : index
    %21 = vector.load %arg5[%c12, %c0_11] : memref<36x256xf32, #tpu.memory_space<vmem>>, vector<4x256xf32>
    tpu.vector_store %arg5[%c12, %c0_11], %20 {strides = array<i32>} : memref<36x256xf32, #tpu.memory_space<vmem>>, vector<4x256xf32>,
    %c16 = arith.constant 16 : index
    %c0_12 = arith.constant 0 : index
    %22 = vector.load %arg5[%c16, %c0_12] : memref<36x256xf32, #tpu.memory_space<vmem>>, vector<4x256xf32>
    tpu.vector_store %arg5[%c16, %c0_12], %1 {strides = array<i32>} : memref<36x256xf32, #tpu.memory_space<vmem>>, vector<4x256xf32>,
    %c255_i32 = arith.constant 255 : i32
    %23 = tpu.dynamic_rotate %1 by %c255_i32 dim 1 : vector<4x256xf32>, i32 -> vector<4x256xf32>
    %c5 = arith.constant 5 : index
    %c0_13 = arith.constant 0 : index
    %24 = vector.load %arg3[%c5, %c0_13] : memref<9x256xf32, #tpu.memory_space<vmem>>, vector<1x256xf32>
    %25 = vector.broadcast %24 : vector<1x256xf32> to vector<4x256xf32>
    %26 = arith.mulf %23, %25 : vector<4x256xf32>
    %c20 = arith.constant 20 : index
    %c0_14 = arith.constant 0 : index
    %27 = vector.load %arg5[%c20, %c0_14] : memref<36x256xf32, #tpu.memory_space<vmem>>, vector<4x256xf32>
    tpu.vector_store %arg5[%c20, %c0_14], %26 {strides = array<i32>} : memref<36x256xf32, #tpu.memory_space<vmem>>, vector<4x256xf32>,
    %c241_i32 = arith.constant 241 : i32
    %28 = tpu.dynamic_rotate %1 by %c241_i32 dim 1 : vector<4x256xf32>, i32 -> vector<4x256xf32>
    %c6 = arith.constant 6 : index
    %c0_15 = arith.constant 0 : index
    %29 = vector.load %arg3[%c6, %c0_15] : memref<9x256xf32, #tpu.memory_space<vmem>>, vector<1x256xf32>
    %30 = vector.broadcast %29 : vector<1x256xf32> to vector<4x256xf32>
    %31 = arith.mulf %28, %30 : vector<4x256xf32>
    %c24 = arith.constant 24 : index
    %c0_16 = arith.constant 0 : index
    %32 = vector.load %arg5[%c24, %c0_16] : memref<36x256xf32, #tpu.memory_space<vmem>>, vector<4x256xf32>
    tpu.vector_store %arg5[%c24, %c0_16], %31 {strides = array<i32>} : memref<36x256xf32, #tpu.memory_space<vmem>>, vector<4x256xf32>,
    %c240_i32 = arith.constant 240 : i32
    %33 = tpu.dynamic_rotate %1 by %c240_i32 dim 1 : vector<4x256xf32>, i32 -> vector<4x256xf32>
    %c7 = arith.constant 7 : index
    %c0_17 = arith.constant 0 : index
    %34 = vector.load %arg3[%c7, %c0_17] : memref<9x256xf32, #tpu.memory_space<vmem>>, vector<1x256xf32>
    %35 = vector.broadcast %34 : vector<1x256xf32> to vector<4x256xf32>
    %36 = arith.mulf %33, %35 : vector<4x256xf32>
    %c28 = arith.constant 28 : index
    %c0_18 = arith.constant 0 : index
    %37 = vector.load %arg5[%c28, %c0_18] : memref<36x256xf32, #tpu.memory_space<vmem>>, vector<4x256xf32>
    tpu.vector_store %arg5[%c28, %c0_18], %36 {strides = array<i32>} : memref<36x256xf32, #tpu.memory_space<vmem>>, vector<4x256xf32>,
    %c239_i32 = arith.constant 239 : i32
    %38 = tpu.dynamic_rotate %1 by %c239_i32 dim 1 : vector<4x256xf32>, i32 -> vector<4x256xf32>
    %c8_19 = arith.constant 8 : index
    %c0_20 = arith.constant 0 : index
    %39 = vector.load %arg3[%c8_19, %c0_20] : memref<9x256xf32, #tpu.memory_space<vmem>>, vector<1x256xf32>
    %40 = vector.broadcast %39 : vector<1x256xf32> to vector<4x256xf32>
    %41 = arith.mulf %38, %40 : vector<4x256xf32>
    %c32 = arith.constant 32 : index
    %c0_21 = arith.constant 0 : index
    %42 = vector.load %arg5[%c32, %c0_21] : memref<36x256xf32, #tpu.memory_space<vmem>>, vector<4x256xf32>
    tpu.vector_store %arg5[%c32, %c0_21], %41 {strides = array<i32>} : memref<36x256xf32, #tpu.memory_space<vmem>>, vector<4x256xf32>,
    %c0_22 = arith.constant 0 : index
    %c0_23 = arith.constant 0 : index
    %43 = vector.load %arg2[%c0_22, %c0_23] : memref<8x36xf32, #tpu.memory_space<vmem>>, vector<8x36xf32>
    %c0_24 = arith.constant 0 : index
    %c0_25 = arith.constant 0 : index
    %44 = vector.load %arg5[%c0_24, %c0_25] : memref<36x256xf32, #tpu.memory_space<vmem>>, vector<36x256xf32>
    %cst = arith.constant dense<0.000000e+00> : vector<8x256xf32>
    %45 = tpu.matmul %43, %44, %cst {dimension_numbers = #tpu.dot_dimension_numbers<[1], [0], [0], [1], [0, 0, 1, 1], [], []>} : vector<8x36xf32>, vector<36x256xf32>, vector<8x256xf32> -> vector<8x256xf32>
    %cst_26 = arith.constant dense<0.000000e+00> : vector<8xf32>
    %46 = vector.multi_reduction <add>, %45, %cst_26 [1] : vector<8x256xf32> to vector<8xf32>
    %47 = vector.shape_cast %46 : vector<8xf32> to vector<8x1xf32>
    %cst_27 = arith.constant 3.906250e-03 : f32
    %48 = vector.broadcast %cst_27 : f32 to vector<8x1xf32>
    %49 = arith.mulf %47, %48 : vector<8x1xf32>
    %50 = arith.mulf %45, %45 : vector<8x256xf32>
    %cst_28 = arith.constant dense<0.000000e+00> : vector<8xf32>
    %51 = vector.multi_reduction <add>, %50, %cst_28 [1] : vector<8x256xf32> to vector<8xf32>
    %52 = vector.shape_cast %51 : vector<8xf32> to vector<8x1xf32>
    %cst_29 = arith.constant 3.906250e-03 : f32
    %53 = vector.broadcast %cst_29 : f32 to vector<8x1xf32>
    %54 = arith.mulf %52, %53 : vector<8x1xf32>
    %55 = arith.mulf %49, %49 : vector<8x1xf32>
    %56 = arith.subf %54, %55 : vector<8x1xf32>
    %57 = vector.broadcast %49 : vector<8x1xf32> to vector<8x256xf32>
    %58 = arith.subf %45, %57 : vector<8x256xf32>
    %cst_30 = arith.constant 9.99999974E-6 : f32
    %59 = vector.broadcast %cst_30 : f32 to vector<8x1xf32>
    %60 = arith.addf %56, %59 : vector<8x1xf32>
    %61 = math.rsqrt %60 : vector<8x1xf32>
    %62 = vector.broadcast %61 : vector<8x1xf32> to vector<8x256xf32>
    %63 = arith.mulf %58, %62 : vector<8x256xf32>
    %cst_31 = arith.constant 0.000000e+00 : f32
    %64 = vector.broadcast %cst_31 : f32 to vector<8x256xf32>
    %65 = arith.maximumf %63, %64 : vector<8x256xf32>
    %c0_32 = arith.constant 0 : index
    %c0_33 = arith.constant 0 : index
    %c0_34 = arith.constant 0 : index
    %66 = vector.load %arg4[%c0_32, %c0_33, %c0_34] : memref<1x8x256xf32, #tpu.memory_space<vmem>>, vector<1x8x256xf32>
    %67 = vector.shape_cast %66 : vector<1x8x256xf32> to vector<8x256xf32>
    %68 = vector.shape_cast %65 : vector<8x256xf32> to vector<1x8x256xf32>
    tpu.vector_store %arg4[%c0_32, %c0_33, %c0_34], %68 {strides = array<i32>} : memref<1x8x256xf32, #tpu.memory_space<vmem>>, vector<1x8x256xf32>,
    return
  }
  func.func @transform_0(%arg0: i32) -> (i32, i32, i32) {
    %c0_i32 = arith.constant 0 : i32
    %c0_i32_0 = arith.constant 0 : i32
    %c0_i32_1 = arith.constant 0 : i32
    return %arg0, %c0_i32, %c0_i32_0 : i32, i32, i32
  }
  func.func @transform_1(%arg0: i32) -> (i32, i32) {
    %c0_i32 = arith.constant 0 : i32
    %c0_i32_0 = arith.constant 0 : i32
    %c0_i32_1 = arith.constant 0 : i32
    return %c0_i32, %c0_i32_0 : i32, i32
  }
  func.func @transform_2(%arg0: i32) -> (i32, i32) {
    %c0_i32 = arith.constant 0 : i32
    %c0_i32_0 = arith.constant 0 : i32
    %c0_i32_1 = arith.constant 0 : i32
    return %c0_i32, %c0_i32_0 : i32, i32
  }
  func.func @transform_3(%arg0: i32) -> (i32, i32, i32) {
    %c0_i32 = arith.constant 0 : i32
    %c0_i32_0 = arith.constant 0 : i32
    %c0_i32_1 = arith.constant 0 : i32
    return %arg0, %c0_i32, %c0_i32_0 : i32, i32, i32
  }
}

</mosaic_0001>

<bundles_post_ra>
// kernel: tpu_custom_call.1
= control target key start
LH: loop header
LB: loop body
LE: loop exit
PB: predicated region body
PF: predicated region fallthrough
CT: control target
= control target key end

     0   :  { %8 = vsyncpa [#allocation4], 0  ;;  %s1092_s0 = inlined_call_operand.hbm [shape: f32[2,4,256], index: 0, kind: input, shape index: {}]   ;;  %s1093_s1 = inlined_call_operand.hbm [shape: f32[8,36], index: 1, kind: input, shape index: {}]   ;;  %s1094_s2 = inlined_call_operand.hbm [shape: f32[9,256], index: 2, kind: input, shape index: {}]   ;;  %s1095_s3 = inlined_call_operand.hbm [shape: f32[2,8,256], index: 3, kind: output, shape index: {}]  }
   0x1   :  { %10 = vsyncpa [#allocation4 + $0x1], 0 }
   0x2   :  { %11 = vsyncpa [#allocation7], 0 }
   0x3   :  { %12 = vsyncpa [#allocation5], 0 }
   0x4   :  { %14 = vsyncpa [#allocation5 + $0x1], 0  ;;  %s934_s12 = smov 0   ;;  %s936_s13 = smov 0  }
   0x5   :  { %s938_s14 = smov 0   ;;  %s940_s15 = smov 0  }
   0x6 LB: > { %s955_s16 = sadd.s32 4294967295, %s900_s15   ;;  %s637_s17 = sadd.s32 4294967294, %s900_s15   ;;  %s900_s15 = sphi %s940_s15, %s1105_s15   ;;  %s896_s14 = sphi %s938_s14, %s1104_s14   ;;  %s892_s13 = sphi %s936_s13, %s1103_s13   ;;  %s888_s12 = sphi %s934_s12, %s1102_s12  }
   0x7   : > { %p40_p0 = scmp.ne.s32.totalorder %s892_s13, %s888_s12  ;;  %p41_p1 = scmp.eq.s32.totalorder %s955_s16, 0 }
   0x8   : > { %p106_p2 = scmp.eq.s32.totalorder %s955_s16, 1  ;;  %p112_p3 = scmp.eq.s32.totalorder %s637_s17, 1 }
   0x9   : > { %p964_p4 = por %p41_p1, %p40_p0  ;;  %p638_p5 = scmp.ge.s32.totalorder %s900_s15, 1 }
   0xa   : > { %p969_p6 = por %p112_p3, %p40_p0  ;;  %p119_p7 = scmp.lt.s32.totalorder %s900_s15, 3 }
   0xb   : > { %s131_s22 = sshll.u32 %s1093_s1, 4  ;;  %s902_s24 = smov [#allocation6]   ;;  %s132_s22 = int_to_ptr.hbm [resolvable:$true] %s131_s22 }
   0xc   : > { %p977_p8 = pnand %p638_p5, %p119_p7  ;;  %s133_s25 = sshll.u32 %s902_s24, 4  ;;  %s134_s25 = int_to_ptr.vmem [resolvable:$true] %s133_s25 }
   0xd   : > { %s142_s28 = sshll.u32 %s1094_s2, 4  ;;  %s903_s29 = smov [#allocation8]   ;;  %s143_s28 = int_to_ptr.hbm [resolvable:$true] %s142_s28 }
   0xe   : > { %p673_p10 = pneg %p977_p8  ;;  %s144_s30 = sshll.u32 %s903_s29, 4  ;;  %s145_s30 = int_to_ptr.vmem [resolvable:$true] %s144_s30 }
   0xf   : > { %s904_s4 = smov 256   ;;  %s905_s5 = smov 16  }
  0x10   : > { %p674_p11 = pnand %p673_p10, %p41_p1  ;;  %s990_s6 = sadd.s32 1, %s900_s15  }
  0x11   : > { %s24_s7 = ssub.s32 %s900_s15, %s990_s6  ;;  %s27_s8 = sadd.s32 1, %s896_s14 }
  0x12   : > { %676 = dma.hbm_to_vmem [thread:$0]  (!%p674_p11), %s132_s22, 128, %s134_s25, [#allocation7]  }
  0x13   : > { %679 = dma.hbm_to_vmem [thread:$0]  (!%p674_p11), %s143_s28, 512, %s145_s30, [#allocation7], %s904_s4, %s904_s4, %s905_s5  }
  0x14   : > { %p25_p12 = scmp.eq.s32.totalorder %s24_s7, 0  ;;  %p34_p13 = scmp.ne.s32.totalorder %s896_s14, %s892_s13 }
  0x15   : > { %p35_p0 = scmp.eq.s32.totalorder %s900_s15, 0  ;;  %p690_p7 = scmp.lt.s32.totalorder %s900_s15, 2 }
  0x16   : > { %s999_s9 = scalar_select %p25_p12, %s896_s14, %s27_s8  }
  0x17   : > { %p36_p3 = por %p35_p0, %p34_p13  ;;  %p1003_p5 = por %p106_p2, %p34_p13 }
  0x18   : > { %s158_s11 = sand.u32 1, %s896_s14   ;;  %s659_s20 = sshll.u32 %s900_s15, 3 }
  0x19   : > { %s642_s17 = sshll.u32 %s158_s11, 3  ;;  %s167_s24 = scalar_lea.hbm %s1092_s0, %s659_s20 }
  0x1a   : > { %s162_s25 = scalar_lea.vmem [#allocation3], %s642_s17  ;;  %s169_s27 = sshll.u32 %s167_s24, 4  ;;  %s170_s27 = int_to_ptr.hbm [resolvable:$true] %s169_s27 }
  0x1b   : > { %s171_s26 = sshll.u32 %s162_s25, 4  ;;  %p1013_p10 = pnand %p690_p7, %p36_p3  ;;  %s172_s26 = int_to_ptr.vmem [resolvable:$true] %s171_s26 }
  0x1c   : > { %s159_s29 = scalar_lea.sflag [#allocation4], %s158_s11  ;;  %s800_s30 = sshra.s32 %s170_s27, 4  ;;  %s801_s30 = int_to_ptr.hbm [resolvable:$true] %s800_s30 }
  0x1d   : > { %s802_s4 = scalar_lea.hbm %s801_s30, 8  ;;  %p804_p11 = pneg %p1013_p10 }
  0x1e   : > { %p803_p2 = scmp.ne.s32.totalorder %s801_s30, %s802_s4  ;;  %s807_s8 = scalar_lea.hbm %s1092_s0, 16 }
  0x1f   : > { %p808_p0 = scmp.lt.s32.totalorder %s801_s30, %s1092_s0  ;;  %p809_p3 = scmp.lt.s32.totalorder %s807_s8, %s802_s4 }
  0x20   : > { %p805_p12 = pnand %p804_p11, %p803_p2 }
  0x21   : > { %p810_p7 = por %p809_p3, %p808_p0 }
  0x22   : > { %p806_p13 = pneg %p805_p12 }
  0x24   : > { %p811_p9 = pnand %p810_p7, %p806_p13 }
  0x26   : > { %814 = shalt.err (!%p811_p9)
}
  0x27   : > { %683 = dma.hbm_to_vmem [thread:$0]  (!%p1013_p10), %s170_s27, 128, %s172_s26, %s159_s29  }
  0x28   : > { %180 = sbr.rel (%p977_p8) target bundleno = 545 (0x221), region = 32  ;;  %s1030_s11 = sand.u32 (!%p977_p8), 1, %s892_s13  }
  0x29   : > { %s646_s21 = sshll.u32 (!%p977_p8), %s1030_s11, 3  ;;  %s183_s22 = scalar_lea.sflag (!%p977_p8), [#allocation4], %s1030_s11 }
  0x2a   : > { %s186_s24 = scalar_lea.vmem (!%p977_p8), [#allocation3], %s646_s21 }
  0x2d   : > { %875 = dma.done.wait (%p964_p4), %s183_s22, 128  }
  0x2e   : > { %877 = vsyncadd (%p964_p4), %s183_s22, 4294967168 }
  0x2f   : > { %879 = dma.done.wait (%p41_p1), [#allocation7], 640  }
  0x30   : > { %881 = vsyncadd (%p41_p1), [#allocation7], 4294966656  ;;  %v220_v0 = vld [vmem:[%s186_s24] sm:$0xff]  ;;  %s906_s23 = smov 16   ;;  %s907_s18 = smov 15   ;;  %v231_v20 = vlaneseq  ;;  %vm453_vm8 = vcmask 1043456  }
  0x31   : > { %222 = vst [vmem:[#allocation1] ss:$2 sm:$0xff] %v220_v0  ;;  %s908_s25 = smov 1   ;;  %s909_s26 = smov 127   ;;  %vm449_vm9 = vcmask 293888  }
  0x32   : > { %s910_s27 = smov 113   ;;  %s911_s28 = smov 112   ;;  %v1044_v21 = vand.u32 127, %v231_v20  ;;  %v259_v22 = vld [vmem:[#allocation8 + $0x1] ss:$8 sm:$0x3] }
  0x33   : > { %s912_s29 = smov 17   ;;  %s913_s30 = smov 111   ;;  %v261_v23 = vperm.slane %v259_v22, 0  ;;  %v262_v24 = vperm.slane %v259_v22, 1 }
  0x34   : > { %vm255_vm0 = vcmp.lt.s32.totalorder %v1044_v21, 16  ;;  %v311_v35 = vld [vmem:[#allocation8 + $0x3] ss:$8 sm:$0x3]  ;;  %vm307_vm1 = vcmp.lt.s32.totalorder %v1044_v21, 1  ;;  %vm343_vm2 = vcmp.lt.s32.totalorder %v1044_v21, 127 }
  0x35   : > { %v313_v36 = vperm.slane %v311_v35, 0  ;;  %v314_v37 = vperm.slane %v311_v35, 1  ;;  %v347_v39 = vld [vmem:[#allocation8 + $0x5] ss:$8 sm:$0x3]  ;;  %vm372_vm3 = vcmp.lt.s32.totalorder %v1044_v21, 113 }
  0x36   : > { %v349_v42 = vperm.slane %v347_v39, 0  ;;  %v350_v43 = vperm.slane %v347_v39, 1  ;;  %v376_v55 = vld [vmem:[#allocation8 + $0x6] ss:$8 sm:$0x3]  ;;  %vm395_vm4 = vcmp.lt.s32.totalorder %v1044_v21, 112 }
  0x37   : > { %v378_v56 = vperm.slane %v376_v55, 0  ;;  %v379_v57 = vperm.slane %v376_v55, 1  ;;  %vm233_vm5 = vcmp.lt.s32.totalorder %v1044_v21, 17  ;;  %vm424_vm6 = vcmp.lt.s32.totalorder %v1044_v21, 111  ;;  %s649_s4 = sshll.u32 %s1030_s11, 4  ;;  %s660_s5 = sshll.u32 %s955_s16, 4 }
  0x38   : > { %v223_v1 = vld.sshfl [vmem:[#allocation1] sm:$0xff pattern:$0x75316420]  ;;  %v224_v2 = vld.sshfl [vmem:[#allocation1 + $0x8] sm:$0xff pattern:$0x75316420]  ;;  %s543_s17 = scalar_lea.hbm %s1095_s3, %s660_s5 }
  0x39   : > { %246 = vst [vmem:[#allocation1] ss:$2 sm:$0xff] %v220_v0  ;;  %vm284_vm7 = vcmp.lt.s32.totalorder %v1044_v21, 15  ;;  %s219_s20 = scalar_lea.vmem [#allocation9], %s649_s4  ;;  %s547_s22 = sshll.u32 %s543_s17, 4  ;;  %s548_s22 = int_to_ptr.hbm [resolvable:$true] %s547_s22 }
  0x3a   : > { %s545_s21 = sshll.u32 %s219_s20, 4  ;;  %s532_s16 = scalar_lea.sflag [#allocation5], %s1030_s11  ;;  %s546_s21 = int_to_ptr.vmem [resolvable:$true] %s545_s21 }
  0x3b   : > { %s844_s24 = sshra.s32 %s548_s22, 4  ;;  %s845_s24 = int_to_ptr.hbm [resolvable:$true] %s844_s24 }
  0x3c   : > { %p851_p9 = scmp.lt.s32.totalorder %s845_s24, %s1095_s3 }
  0x40   : > { %v247_v3 = vld.sshfl [vmem:[#allocation1] sm:$0xff pattern:$0x75316420]  ;;  %v248_v4 = vld.sshfl [vmem:[#allocation1 + $0x8] sm:$0xff pattern:$0x75316420] }
  0x41   : > { %275 = vst [vmem:[#allocation1] ss:$2 sm:$0xff] %v220_v0  ;;  %251 = vrot.lane.b32.xlu1 %v247_v3, %s906_s23  ;;  %253 = vrot.lane.b32.xlu2 %v248_v4, %s906_s23  ;;  %s846_s23 = scalar_lea.hbm %s845_s24, 16 }
  0x42   : > { %p847_p1 = scmp.ne.s32.totalorder %s845_s24, %s846_s23 }
  0x44   : > { %p848_p4 = pnand %p847_p1, %p1003_p5 }
  0x46   : > { %p849_p8 = pneg %p848_p4 }
  0x48   : > { %v276_v5 = vld.sshfl [vmem:[#allocation1] sm:$0xff pattern:$0x75316420]  ;;  %v277_v6 = vld.sshfl [vmem:[#allocation1 + $0x8] sm:$0xff pattern:$0x75316420] }
  0x49   : > { %280 = vrot.lane.b32.xlu0 %v276_v5, %s907_s18  ;;  %298 = vst [vmem:[#allocation1] ss:$2 sm:$0xff] %v220_v0 }
  0x50   : > { %v299_v7 = vld.sshfl [vmem:[#allocation1] sm:$0xff pattern:$0x75316420]  ;;  %v300_v8 = vld.sshfl [vmem:[#allocation1 + $0x8] sm:$0xff pattern:$0x75316420] }
  0x51   : > { %305 = vrot.lane.b32.xlu0 %v300_v8, %s908_s25  ;;  %327 = vst [vmem:[#allocation1] ss:$2 sm:$0xff] %v220_v0  ;;  %303 = vrot.lane.b32.xlu2 %v299_v7, %s908_s25 }
  0x58   : > { %v328_v9 = vld.sshfl [vmem:[#allocation1] sm:$0xff pattern:$0x75316420]  ;;  %v329_v10 = vld.sshfl [vmem:[#allocation1 + $0x8] sm:$0xff pattern:$0x75316420] }
  0x59   : > { %334 = vst [vmem:[#allocation1] ss:$2 sm:$0xff] %v220_v0 }
  0x5a   : > { %332 = vst [vmem:[#allocation2 + $0x48] sm:$0xf] %v328_v9 }
  0x5b   : > { %333 = vst [vmem:[#allocation2 + $0x28] sm:$0xf] %v329_v10  ;;  %v236_v10 = vld [vmem:[#allocation8] ss:$8 sm:$0x3] }
  0x60   : > { %v335_v11 = vld.sshfl [vmem:[#allocation1] sm:$0xff pattern:$0x75316420]  ;;  %v336_v12 = vld.sshfl [vmem:[#allocation1 + $0x8] sm:$0xff pattern:$0x75316420] }
  0x61   : > { %363 = vst [vmem:[#allocation1] ss:$2 sm:$0xff] %v220_v0  ;;  %339 = vrot.lane.b32.xlu2 %v335_v11, %s909_s26  ;;  %v428_v11 = vld [vmem:[#allocation8 + $0x10] ss:$8 sm:$0x3] }
  0x68   : > { %v364_v13 = vld.sshfl [vmem:[#allocation1] sm:$0xff pattern:$0x75316420]  ;;  %v365_v14 = vld.sshfl [vmem:[#allocation1 + $0x8] sm:$0xff pattern:$0x75316420] }
  0x69   : > { %368 = vrot.lane.b32.xlu0 %v364_v13, %s910_s27  ;;  %370 = vrot.lane.b32.xlu1 %v365_v14, %s910_s27  ;;  %386 = vst [vmem:[#allocation1] ss:$2 sm:$0xff] %v220_v0 }
  0x6a   : > { %341 = vrot.lane.b32.xlu2 %v336_v12, %s909_s26  ;;  %s850_s26 = scalar_lea.hbm %s1095_s3, 32 }
  0x6b   : > { %p852_p10 = scmp.lt.s32.totalorder %s850_s26, %s846_s23 }
  0x6d   : > { %p853_p2 = por %p852_p10, %p851_p9 }
  0x6f   : > { %p854_p11 = pnand %p853_p2, %p849_p8 }
  0x70   : > { %v387_v15 = vld.sshfl [vmem:[#allocation1] sm:$0xff pattern:$0x75316420]  ;;  %v388_v16 = vld.sshfl [vmem:[#allocation1 + $0x8] sm:$0xff pattern:$0x75316420] }
  0x71   : > { %391 = vrot.lane.b32.xlu0 %v387_v15, %s911_s28  ;;  %415 = vst [vmem:[#allocation1] ss:$2 sm:$0xff] %v220_v0  ;;  %v238_v15 = vperm.slane %v236_v10, 0 }
  0x72   : > { %227 = vrot.lane.b32.xlu2 %v223_v1, %s912_s29  ;;  %v399_v1 = vld [vmem:[#allocation8 + $0x7] ss:$8 sm:$0x3] }
  0x73   : > { %v402_v3 = vperm.slane %v399_v1, 1 }
  0x78   : > { %v416_v17 = vld.sshfl [vmem:[#allocation1] sm:$0xff pattern:$0x75316420]  ;;  %v417_v18 = vld.sshfl [vmem:[#allocation1 + $0x8] sm:$0xff pattern:$0x75316420] }
  0x79   : > { %393 = vrot.lane.b32.xlu0 %v388_v16, %s911_s28  ;;  %420 = vrot.lane.b32.xlu1 %v416_v17, %s913_s30  ;;  %v239_v16 = vperm.slane %v236_v10, 1  ;;  %v430_v17 = vperm.slane %v428_v11, 0 }
  0x81   : > { %229 = vrot.lane.b32.xlu0 %v224_v2, %s912_s29  ;;  %422 = vrot.lane.b32.xlu1 %v417_v18, %s913_s30  ;;  %v401_v2 = vperm.slane %v399_v1, 0  ;;  %v431_v18 = vperm.slane %v428_v11, 1 }
  0x89   : > { %282 = vrot.lane.b32.xlu1 %v277_v6, %s907_s18 }
  0x9b   : > { %v254_v19 = vpop.permute.xlu2 %253 }
  0xab   : > { %v304_v25 = vpop.permute.xlu2 %303 }
  0xb3   : > { %v252_v26 = vpop.permute.xlu1 %251 }
  0xb4   : > { %v256_v27 = vsel %vm255_vm0, %v252_v26, %v254_v19  ;;  %v257_v28 = vsel %vm255_vm0, %v254_v19, %v252_v26 }
  0xb5   : > { %v265_v29 = vmul.f32 %v261_v23, %v257_v28  ;;  %v266_v30 = vmul.f32 %v262_v24, %v256_v27 }
  0xb7   : > { %v269_v31 = vrot.slane %v265_v29, 4  ;;  %v270_v32 = vrot.slane %v266_v30, 4  ;;  %v288_v30 = vld [vmem:[#allocation8 + $0x2] ss:$8 sm:$0x3] }
  0xb9   : > { %273 = vst [vmem:[#allocation2 + $0x30] sm:$0xf0] %v269_v31  ;;  %v290_v31 = vperm.slane %v288_v30, 0 }
  0xba   : > { %274 = vst [vmem:[#allocation2] sm:$0xf0] %v270_v32  ;;  %v291_v32 = vperm.slane %v288_v30, 1 }
  0xbb   : > { %v1047_v33 = vpop.permute.xlu0 %280  ;;  %v340_v34 = vpop.permute.xlu2 %339 }
  0xc3   : > { %v306_v38 = vpop.permute.xlu0 %305 }
  0xc4   : > { %v308_v40 = vsel %vm307_vm1, %v304_v25, %v306_v38  ;;  %v309_v41 = vsel %vm307_vm1, %v306_v38, %v304_v25  ;;  %v342_v44 = vpop.permute.xlu2 %341 }
  0xc5   : > { %v317_v45 = vmul.f32 %v313_v36, %v309_v41  ;;  %v318_v46 = vmul.f32 %v314_v37, %v308_v40  ;;  %v344_v47 = vsel %vm343_vm2, %v340_v34, %v342_v44  ;;  %v345_v48 = vsel %vm343_vm2, %v342_v44, %v340_v34 }
  0xc6   : > { %v353_v49 = vmul.f32 %v349_v42, %v344_v47  ;;  %v354_v50 = vmul.f32 %v350_v43, %v345_v48 }
  0xc7   : > { %v321_v51 = vrot.slane %v317_v45, 4  ;;  %v322_v52 = vrot.slane %v318_v46, 4  ;;  %v438_v45 = vld [vmem:[#allocation6] sm:$0xff] }
  0xc8   : > { %v357_v53 = vrot.slane %v353_v49, 4  ;;  %v358_v54 = vrot.slane %v354_v50, 4 }
  0xc9   : > { %325 = vst [vmem:[#allocation2 + $0x18] sm:$0xf0] %v321_v51 }
  0xca   : > { %326 = vst [vmem:[#allocation2 + $0x10] sm:$0xf0] %v322_v52 }
  0xcb   : > { %361 = vst [vmem:[#allocation2 + $0x48] sm:$0xf0] %v357_v53 }
  0xcc   : > { %362 = vst [vmem:[#allocation2 + $0x28] sm:$0xf0] %v358_v54  ;;  %v228_v14 = vpop.permute.xlu2 %227 }
  0xd2   : > { %v443_v42 = vld [vmem:[#allocation2 + $0x48] sm:$0xff] }
  0xd3   : > { %v444_v43 = vld [vmem:[#allocation2 + $0x28] sm:$0xff] }
  0xdb   : > { %v369_v58 = vpop.permute.xlu0 %368  ;;  %v371_v59 = vpop.permute.xlu1 %370 }
  0xdc   : > { %v373_v60 = vsel %vm372_vm3, %v369_v58, %v371_v59  ;;  %v374_v61 = vsel %vm372_vm3, %v371_v59, %v369_v58 }
  0xdd   : > { %v382_v62 = vmul.f32 %v378_v56, %v373_v60  ;;  %v383_v63 = vmul.f32 %v379_v57, %v374_v61 }
  0xdf   : > { %384 = vst [vmem:[#allocation2 + $0x8] sm:$0xf] %v382_v62 }
  0xe0   : > { %385 = vst [vmem:[#allocation2 + $0x20] sm:$0xf] %v383_v63 }
  0xe3   : > { %v392_v0 = vpop.permute.xlu0 %391 }
  0xeb   : > { %v394_v4 = vpop.permute.xlu0 %393  ;;  %v421_v5 = vpop.permute.xlu1 %420 }
  0xec   : > { %v396_v6 = vsel %vm395_vm4, %v392_v0, %v394_v4  ;;  %v397_v7 = vsel %vm395_vm4, %v394_v4, %v392_v0 }
  0xed   : > { %v405_v8 = vmul.f32 %v401_v2, %v396_v6  ;;  %v406_v9 = vmul.f32 %v402_v3, %v397_v7 }
  0xef   : > { %v409_v12 = vrot.slane %v405_v8, 4  ;;  %v410_v13 = vrot.slane %v406_v9, 4 }
  0xf1   : > { %413 = vst [vmem:[#allocation2 + $0x8] sm:$0xf0] %v409_v12 }
  0xf2   : > { %414 = vst [vmem:[#allocation2 + $0x20] sm:$0xf0] %v410_v13 }
  0xf3   : > { %v230_v19 = vpop.permute.xlu0 %229  ;;  %v423_v20 = vpop.permute.xlu1 %422 }
  0xf4   : > { %v234_v22 = vsel %vm233_vm5, %v228_v14, %v230_v19  ;;  %v235_v23 = vsel %vm233_vm5, %v230_v19, %v228_v14  ;;  %v425_v24 = vsel %vm424_vm6, %v421_v5, %v423_v20  ;;  %v426_v25 = vsel %vm424_vm6, %v423_v20, %v421_v5 }
  0xf5   : > { %v242_v26 = vmul.f32 %v238_v15, %v235_v23  ;;  %v243_v27 = vmul.f32 %v239_v16, %v234_v22  ;;  %v434_v28 = vmul.f32 %v430_v17, %v425_v24  ;;  %v435_v29 = vmul.f32 %v431_v18, %v426_v25 }
  0xf7   : > { %244 = vst [vmem:[#allocation2 + $0x30] sm:$0xf] %v242_v26 }
  0xf8   : > { %245 = vst [vmem:[#allocation2] sm:$0xf] %v243_v27  ;;  %v445_v41 = vld [vmem:[#allocation2 + $0x8] sm:$0xff] }
  0xf9   : > { %436 = vst [vmem:[#allocation2 + $0x40] sm:$0xf] %v434_v28  ;;  %v446_v21 = vld [vmem:[#allocation2 + $0x20] sm:$0xff] }
  0xfa   : > { %437 = vst [vmem:[#allocation2 + $0x38] sm:$0xf] %v435_v29 }
  0xfb   : > { %v283_v34 = vpop.permute.xlu1 %282 }
  0xfc   : > { %v285_v35 = vsel %vm284_vm7, %v1047_v33, %v283_v34  ;;  %v286_v36 = vsel %vm284_vm7, %v283_v34, %v1047_v33 }
  0xfd   : > { %v294_v37 = vmul.f32 %v290_v31, %v286_v36  ;;  %v295_v38 = vmul.f32 %v291_v32, %v285_v35 }
  0xfe   : > { %v439_v46 = vld [vmem:[#allocation2 + $0x30] sm:$0xff] }
  0xff   : > { %296 = vst [vmem:[#allocation2 + $0x18] sm:$0xf] %v294_v37  ;;  %v440_v47 = vld [vmem:[#allocation2] sm:$0xff] }
 0x100   : > { %297 = vst [vmem:[#allocation2 + $0x10] sm:$0xf] %v295_v38  ;;  %v447_v39 = vld [vmem:[#allocation2 + $0x40] sm:$0xf] }
 0x101   : > { %650 = vmatpush.msk.msra.mxu0 %vm453_vm8, %v447_v39  ;;  %v448_v40 = vld [vmem:[#allocation2 + $0x38] sm:$0xf] }
 0x102   : > { %652 = vmatpush.msk.msra.mxu1 %vm453_vm8, %v448_v40 }
 0x103   : > { %472 = vmatpush.msra.mxu0 %v445_v41 }
 0x104   : > { %492 = vmatpush.msra.mxu1 %v446_v21 }
 0x105   : > { %473 = vmatpush.msra.mxu0 %v443_v42 }
 0x106   : > { %493 = vmatpush.msra.mxu1 %v444_v43  ;;  %v441_v44 = vld [vmem:[#allocation2 + $0x18] sm:$0xff] }
 0x107   : > { %474 = vmatpush.msra.mxu0 %v441_v44  ;;  %v442_v33 = vld [vmem:[#allocation2 + $0x10] sm:$0xff] }
 0x108   : > { %494 = vmatpush.msra.mxu1 %v442_v33 }
 0x109   : > { %475 = vmatpush.msra.mxu0 %v439_v46 }
 0x10a   : > { %495 = vmatpush.msra.mxu1 %v440_v47  ;;  %651 = vmatmul.msk.f32.vlgmr.msra.gmra.mxu0 %vm449_vm9, %v438_v45 }
 0x10b   : > { %653 = vmatmul.msk.f32.vlgmr.msra.gmra.mxu1 %vm449_vm9, %v438_v45 }
 0x187   : > { %v477_v48 = vpop.f32.mrf.mxu0 }
 0x188   : > { %v504_v49 = vmul.f32 %v477_v48, %v477_v48  ;;  %v497_v50 = vpop.f32.mrf.mxu1 }
 0x189   : > { %v505_v51 = vmul.f32 %v497_v50, %v497_v50  ;;  %v500_v52 = vadd.f32 %v497_v50, %v477_v48 }
 0x18b   : > { %501 = vadd.xlane.f32.xlu1 %v500_v52  ;;  %v506_v53 = vadd.f32 %v505_v51, %v504_v49 }
 0x18d   : > { %507 = vadd.xlane.f32.xlu2 %v506_v53 }
 0x1fe   : > { %v502_v54 = vpop.xlane.xlu1 %501 }
 0x1ff   : > { %v503_v55 = vmul.f32 0.00390625, %v502_v54 }
 0x200   : > { %v508_v56 = vpop.xlane.xlu2 %507 }
 0x201   : > { %v509_v57 = vmul.f32 0.00390625, %v508_v56  ;;  %v510_v58 = vmul.f32 %v503_v55, %v503_v55  ;;  %v512_v3 = vsub.f32 %v477_v48, %v503_v55  ;;  %v513_v4 = vsub.f32 %v497_v50, %v503_v55 }
 0x203   : > { %v511_v59 = vsub.f32 %v509_v57, %v510_v58 }
 0x205   : > { %v514_v60 = vadd.f32 1e-05, %v511_v59 }
 0x207   : > { %738 = vrsqrt.f32 %v514_v60  ;;  %vm521_vm11 = vweird.f32 %v514_v60 }
 0x20d   : > { %v739_v61 = vpop.eup %738 }
 0x20e   : > { %v516_v62 = vmul.f32 %v739_v61, %v514_v60  ;;  %vm522_vm10 = vweird.f32 %v739_v61 }
 0x20f   : > { %vm523_vm12 = vmor %vm521_vm11, %vm522_vm10 }
 0x210   : > { %v517_v63 = vmul.f32 %v739_v61, %v516_v62 }
 0x212   : > { %v518_v0 = vmul.f32 0.5, %v517_v63 }
 0x214   : > { %v519_v1 = vsub.f32 1.5, %v518_v0 }
 0x216   : > { %v520_v2 = vmul.f32 %v739_v61, %v519_v1 }
 0x218   : > { %v524_v5 = vsel %vm523_vm12, %v739_v61, %v520_v2 }
 0x219   : > { %v525_v6 = vmul.f32 %v524_v5, %v512_v3  ;;  %v526_v7 = vmul.f32 %v524_v5, %v513_v4 }
 0x21b   : > { %v527_v8 = vmax.f32 %v525_v6, 0.0  ;;  %v528_v9 = vmax.f32 %v526_v7, 0.0 }
 0x21d   : > { %529 = vst [vmem:[%s219_s20] sm:$0xff] %v527_v8 }
 0x21e   : > { %530 = vst [vmem:[%s219_s20 + $0x8] sm:$0xff] %v528_v9 }
 0x21f   : > { %857 = shalt.err (!%p854_p11)
}
 0x220   : > { %671 = dma.vmem_to_hbm [thread:$0]  (%p1003_p5), %s546_s21, 256, %s548_s22, %s532_s16  }
 0x221 PF: > { %s559_s11 = sand.u32 1, %s888_s12   ;;  %p1101_p12 = scmp.ge.s32.totalorder %s900_s15, 2 }
 0x222   : > { %s560_s29 = scalar_lea.sflag [#allocation5], %s559_s11 }
 0x223   : > { %p685_p13 = pnand %p1101_p12, %p969_p6 }
 0x225   : > { %p686_p0 = pneg %p685_p13 }
 0x227   : > { %883 = dma.done.wait (%p686_p0), %s560_s29, 256  }
 0x228   : > { %885 = vsyncadd (%p686_p0), %s560_s29, 4294967040  ;;  %p17_p3 = scmp.ge.s32.totalorder %s990_s6, 4   ;;  %s1102_s12 = smov %s892_s13 }
 0x229   : > { %s1103_s13 = smov %s896_s14  ;;  %s1104_s14 = smov %s999_s9 }
 0x22a   : > { %s1105_s15 = smov %s990_s6  ;;  %19 = sbr.rel (!%p17_p3) target bundleno = 6 (0x6), region = 92 }
 0x22f   :  { %566 = vsyncpa [#allocation4], 1 }
 0x230   :  { %568 = vsyncpa [#allocation4 + $0x1], 1 }
 0x231   :  { %569 = vsyncpa [#allocation7], 1 }
 0x232   :  { %570 = vsyncpa [#allocation5], 1 }
 0x233   :  { %572 = vsyncpa [#allocation5 + $0x1], 1 }

</bundles_post_ra>
